<compile_context>
chip_gen: v7x
topology: tpu7x:2x2x1
jax: 0.10.0
libtpu: 0.0.40
codegen_flags: <defaults>
</compile_context>

<pallas_src>
import jax
import jax.numpy as jnp
from jax.experimental import pallas as pl
from jax.experimental.pallas import tpu as pltpu


# Below this many total input elements, a plain XLA concatenate beats any
# pallas_call (launch + pipeline setup is microseconds vs ~1 KB of work).
_PALLAS_MIN_ELEMS = 1 << 14

_LANE = 128          # TPU lane width
_DEFAULT_TILE_N = 512  # lane-tile sweet spot for mem-bound copies (multiple of 128)


def _round_up(x, m):
    return ((x + m - 1) // m) * m


def _strokes_kernel(x_ref, o_ref):
    """One (group, N-tile) block.

    x_ref: (1, D, tn)   lane-dense input tile (N on the lane axis)
    o_ref: (1, D+4, tn) lane-dense output tile
    """
    x = x_ref[0]                      # (D, tn)
    d = x.shape[0]                    # static
    tn = x.shape[1]                   # static
    # Pure sublane-row copies; every store is full-width on the lane axis.
    o_ref[0, :d, :] = x                               # rows 0..D-1 = x
    o_ref[0, d:d + 3, :] = x[d - 3:d, :]              # rows D..D+2 = last 3 params
    o_ref[0, d + 3:d + 4, :] = jnp.zeros((1, tn), x.dtype)  # row D+3 = 0


def _stroke_transform_jax(p):
    """Plain-JAX equivalent of the Stroke.__init__ transform (D >= 3)."""
    return jnp.concatenate(
        [p, p[..., -3:], jnp.zeros_like(p[..., :1])], axis=-1)


def strokes_forward(strokes, use_pallas=None, tile_n=_DEFAULT_TILE_N):
    """JAX/Pallas equivalent of `[s.forward() for s in Strokes(strokes).forward()]`.

    `strokes` is a list of (p, d) tuples (d is ignored, as in the PyTorch
    module).  Returns a list of transformed stroke-parameter arrays of shape
    (N, D + 4).
    """
    params = [jnp.asarray(p) for p, _ in strokes]
    if not params:
        return []

    S = len(params)
    N, D = params[0].shape
    for p in params:
        if p.shape != (N, D):
            raise ValueError("all stroke groups must share the same (N, D) shape")
    if D < 3:
        # padded[..., -7:-4] only maps to original[..., D-3:D] for D >= 3.
        raise ValueError("Stroke transform requires at least 3 params per stroke")

    if use_pallas is None:
        use_pallas = (S * N * D) >= _PALLAS_MIN_ELEMS

    same_dtype = all(p.dtype == params[0].dtype for p in params)
    if not use_pallas or not same_dtype or N == 0:
        return [_stroke_transform_jax(p) for p in params]

    # --- lane-dense layout: (S, D, N), large N axis on the 128-lane dim -----
    x = jnp.stack(params, axis=0).transpose(0, 2, 1)    # (S, D, N)

    if N <= tile_n:
        tn = _round_up(N, _LANE)
    else:
        tn = _round_up(tile_n, _LANE)
    n_pad = _round_up(N, tn)
    if n_pad != N:
        x = jnp.pad(x, ((0, 0), (0, 0), (0, n_pad - N)))  # (S, D, n_pad)

    grid = (S, n_pad // tn)

    out = pl.pallas_call(
        _strokes_kernel,
        out_shape=jax.ShapeDtypeStruct((S, D + 4, n_pad), x.dtype),
        grid=grid,
        in_specs=[pl.BlockSpec((1, D, tn), lambda s, j: (s, 0, j))],
        out_specs=pl.BlockSpec((1, D + 4, tn), lambda s, j: (s, 0, j)),
        compiler_params=pltpu.CompilerParams(
            # No reduction axis: both axes independent -> megacore can shard.
            dimension_semantics=("parallel", "parallel"),
            # Tiny per-step blocks (< 100 KB double-buffered); stay well under
            # every chip's scoped-VMEM default (incl. v7x 64 MiB part).
            vmem_limit_bytes=32 * 1024 * 1024,
        ),
    )(x)

    out = out[:, :, :N].transpose(0, 2, 1)   # (S, N, D + 4), lane padding dropped
    return [out[i] for i in range(S)]


def _reference(p):
    """Pure-JAX reference of the PyTorch Stroke.__init__ transform."""
    padded = jnp.pad(p, ((0, 0), (0, 4)))
    padded = padded.at[..., -4:-1].set(padded[..., -7:-4])
    padded = padded.at[..., -1].set(0.0)
    return padded


if __name__ == "__main__":
    key = jax.random.PRNGKey(0)
    S, N, D = 3, 8, 9  # 3 stroke groups, 8 strokes each, 9 params per stroke

    keys = jax.random.split(key, S)
    strokes = [
        (jax.random.normal(k, (N, D), dtype=jnp.float32), None) for k in keys
    ]

    # Force the Pallas path so the kernel is actually exercised at demo sizes.
    outs = strokes_forward(strokes, use_pallas=True)
    outs = [jax.block_until_ready(o) for o in outs]

    # Verify against pure-JAX reference of the PyTorch semantics.
    for (p, _), o in zip(strokes, outs):
        ref = _reference(p)
        assert o.shape == (N, D + 4), o.shape
        assert jnp.allclose(o, ref, atol=0.0), "mismatch vs reference"

    # Also sanity-check the plain-JAX fast path agrees.
    outs_fast = strokes_forward(strokes, use_pallas=False)
    for o_p, o_j in zip(outs, outs_fast):
        assert jnp.allclose(o_p, o_j, atol=0.0), "pallas vs jax fast-path mismatch"

    print("KERNEL_OK")
</pallas_src>

<mosaic_0001>
module attributes {stable_mosaic.version = 11 : i64} {
  func.func @_strokes_kernel(%arg0: i32, %arg1: i32, %arg2: memref<1x9x128xf32, #tpu.memory_space<vmem>>, %arg3: memref<1x13x128xf32, #tpu.memory_space<vmem>>) attributes {dimension_semantics = [#tpu.dimension_semantics<parallel>, #tpu.dimension_semantics<parallel>], iteration_bounds = array<i64: 3, 1>, scalar_prefetch = 0 : i64, scratch_operands = 0 : i64, tpu.core_type = #tpu.core_type<tc>, window_params = [{transform_indices = @transform_0, window_bounds = array<i64: 1, 9, 128>}, {transform_indices = @transform_1, window_bounds = array<i64: 1, 13, 128>}]} {
    %c0 = arith.constant 0 : index
    %c0_0 = arith.constant 0 : index
    %c0_1 = arith.constant 0 : index
    %0 = vector.load %arg2[%c0, %c0_0, %c0_1] : memref<1x9x128xf32, #tpu.memory_space<vmem>>, vector<1x9x128xf32>
    %1 = vector.shape_cast %0 : vector<1x9x128xf32> to vector<9x128xf32>
    %c0_2 = arith.constant 0 : index
    %c0_3 = arith.constant 0 : index
    %c0_4 = arith.constant 0 : index
    %2 = vector.load %arg3[%c0_2, %c0_3, %c0_4] : memref<1x13x128xf32, #tpu.memory_space<vmem>>, vector<1x9x128xf32>
    %3 = vector.shape_cast %2 : vector<1x9x128xf32> to vector<9x128xf32>
    %4 = vector.shape_cast %1 : vector<9x128xf32> to vector<1x9x128xf32>
    tpu.vector_store %arg3[%c0_2, %c0_3, %c0_4], %4 {strides = array<i32>} : memref<1x13x128xf32, #tpu.memory_space<vmem>>, vector<1x9x128xf32>,
    %5 = vector.extract_strided_slice %1 {offsets = [6, 0], sizes = [3, 128], strides = [1, 1]} : vector<9x128xf32> to vector<3x128xf32>
    %c0_5 = arith.constant 0 : index
    %c9 = arith.constant 9 : index
    %c0_6 = arith.constant 0 : index
    %6 = vector.load %arg3[%c0_5, %c9, %c0_6] : memref<1x13x128xf32, #tpu.memory_space<vmem>>, vector<1x3x128xf32>
    %7 = vector.shape_cast %6 : vector<1x3x128xf32> to vector<3x128xf32>
    %8 = vector.shape_cast %5 : vector<3x128xf32> to vector<1x3x128xf32>
    tpu.vector_store %arg3[%c0_5, %c9, %c0_6], %8 {strides = array<i32>} : memref<1x13x128xf32, #tpu.memory_space<vmem>>, vector<1x3x128xf32>,
    %cst = arith.constant 0.000000e+00 : f32
    %9 = vector.broadcast %cst : f32 to vector<1x128xf32>
    %c0_7 = arith.constant 0 : index
    %c12 = arith.constant 12 : index
    %c0_8 = arith.constant 0 : index
    %10 = vector.load %arg3[%c0_7, %c12, %c0_8] : memref<1x13x128xf32, #tpu.memory_space<vmem>>, vector<1x1x128xf32>
    %11 = vector.shape_cast %10 : vector<1x1x128xf32> to vector<1x128xf32>
    %12 = vector.shape_cast %9 : vector<1x128xf32> to vector<1x1x128xf32>
    tpu.vector_store %arg3[%c0_7, %c12, %c0_8], %12 {strides = array<i32>} : memref<1x13x128xf32, #tpu.memory_space<vmem>>, vector<1x1x128xf32>,
    return
  }
  func.func @transform_0(%arg0: i32, %arg1: i32) -> (i32, i32, i32) {
    %c0_i32 = arith.constant 0 : i32
    %c0_i32_0 = arith.constant 0 : i32
    return %arg0, %c0_i32, %arg1 : i32, i32, i32
  }
  func.func @transform_1(%arg0: i32, %arg1: i32) -> (i32, i32, i32) {
    %c0_i32 = arith.constant 0 : i32
    %c0_i32_0 = arith.constant 0 : i32
    return %arg0, %c0_i32, %arg1 : i32, i32, i32
  }
}

</mosaic_0001>

<bundles_post_ra>
// kernel: tpu_custom_call.1
= control target key start
LH: loop header
LB: loop body
LE: loop exit
PB: predicated region body
PF: predicated region fallthrough
CT: control target
= control target key end

     0   :  { %6 = vsyncpa [#allocation3], 0  ;;  %s522_s0 = inlined_call_operand.vmem [shape: f32[3,9,128], index: 0, kind: input, shape index: {}]   ;;  %s523_s1 = inlined_call_operand.hbm [shape: f32[3,13,128], index: 1, kind: output, shape index: {}]  }
   0x1   :  { %8 = vsyncpa [#allocation3 + $0x1], 0  ;;  %s407_s6 = smov 0   ;;  %s409_s7 = smov 0  }
   0x2   :  { %s411_s8 = smov 0   ;;  %s413_s9 = smov 0  }
   0x3   :  { %s415_s10 = smov 0   ;;  %s417_s11 = smov 0  }
   0x4 LB: > { %s240_s12 = sadd.s32 4294967295, %s391_s11   ;;  %s241_s13 = sadd.s32 4294967294, %s391_s11   ;;  %s391_s11 = sphi %s417_s11, %s14_s11   ;;  %s387_s10 = sphi %s415_s10, %s530_s10   ;;  %s383_s9 = sphi %s413_s9, %s529_s9   ;;  %s379_s8 = sphi %s411_s8, %s528_s8   ;;  %s375_s7 = sphi %s409_s7, %s527_s7   ;;  %s371_s6 = sphi %s407_s6, %s526_s6  }
   0x5   : > { %s26_s14 = sadd.s32 1, %s387_s10  ;;  %s63_s15 = sadd.s32 1, %s379_s8 }
   0x6   : > { %p28_p0 = scmp.ge.s32.totalorder %s26_s14, 3  ;;  %p73_p1 = scmp.ne.s32.totalorder %s379_s8, %s375_s7 }
   0x7   : > { %p74_p2 = scmp.eq.s32.totalorder %s240_s12, 2  ;;  %p79_p3 = scmp.ne.s32.totalorder %s375_s7, %s371_s6 }
   0x8   : > { %s532_s14 = smov (%p28_p0, %s26_s14), 0  ;;  %p80_p5 = scmp.eq.s32.totalorder %s241_s13, 2 }
   0x9   : > { %p447_p4 = por %p74_p2, %p73_p1  ;;  %s58_s17 = ssub.s32 %s387_s10, %s532_s14 }
   0xa   : > { %p244_p6 = scmp.ge.s32.totalorder %s391_s11, 1  ;;  %p61_p7 = scmp.eq.s32.totalorder %s58_s17, 0 }
   0xb   : > { %p454_p8 = por %p80_p5, %p79_p3  ;;  %p109_p9 = scmp.lt.s32.totalorder %s391_s11, 4 }
   0xc   : > { %s460_s19 = scalar_select %p61_p7, %s379_s8, %s63_s15  }
   0xd   : > { %p110_p10 = pnand %p244_p6, %p109_p9 }
   0xe   : > { %s129_s20 = sand.u32 (!%p110_p10), 1, %s375_s7   ;;  %p132_p11 = scmp.lt.s32.totalorder (!%p110_p10), %s383_s9, 2  ;;  %v393_v0 = vmov (!%p110_p10), 0.0  }
   0xf   : > { %113 = sbr.rel (%p110_p10) target bundleno = 46 (0x2e), region = 24  ;;  %s245_s21 = sshll.u32 (!%p110_p10), %s129_s20, 4 }
  0x10   : > { %s254_s22 = sshll.u32 (!%p110_p10), %s383_s9, 8  ;;  %s131_s23 = scalar_lea.vmem (!%p110_p10), [#allocation2], %s245_s21 }
  0x11   : > { %146 = vst [vmem:[%s131_s23 + $0xc] sm:$0x1] (!%p110_p10), %v393_v0  ;;  %s162_s24 = sshll.u32 (!%p110_p10), %s131_s23, 4  ;;  %s469_s27 = scalar_lea.hbm (!%p110_p10), %s523_s1, %s254_s22  ;;  %s471_s24 = int_to_ptr.vmem [resolvable:$true] %s162_s24 }
  0x12   : > { %s476_s3 = scalar_lea.sflag (!%p110_p10), [#allocation3], %s129_s20  ;;  %s313_s4 = scalar_lea.vmem (!%p110_p10), %s471_s24, 256 }
  0x13   : > { %p314_p12 = scmp.ne.s32.totalorder (!%p110_p10), %s471_s24, %s313_s4  ;;  %s394_s5 = smov (!%p110_p10), [#allocation2]  }
  0x15   : > { %p315_p13 = pnand (!%p110_p10), %p314_p12, %p447_p4 }
  0x16   : > { %s534_s9 = smov (!%p132_p11, %s383_s9), 2 }
  0x17   : > { %s253_s28 = sshll.u32 %s534_s9, 4  ;;  %p316_p0 = pneg %p315_p13 }
  0x18   : > { %s139_s2 = scalar_lea.vmem %s522_s0, %s253_s28  ;;  %s317_s9 = sshll.u32 %s394_s5, 4  ;;  %s318_s9 = int_to_ptr.vmem [resolvable:$false] %s317_s9 }
  0x19   : > { %v140_v1 = vld [vmem:[%s139_s2] sm:$0xff]  ;;  %v141_v2 = vld [vmem:[%s139_s2 + $0x8] sm:$0x1]  ;;  %s319_s12 = scalar_lea.vmem %s318_s9, 512  ;;  %p320_p1 = scmp.lt.s32.totalorder %s471_s24, %s318_s9 }
  0x1a   : > { %142 = vst [vmem:[%s131_s23] sm:$0xff] %v140_v1  ;;  %144 = vst [vmem:[%s131_s23 + $0x3] sm:$0xc0] %v140_v1  ;;  %p321_p2 = scmp.lt.s32.totalorder %s319_s12, %s313_s4 }
  0x1b   : > { %143 = vst [vmem:[%s131_s23 + $0x8] sm:$0x1] %v141_v2  ;;  %145 = vst [vmem:[%s131_s23 + $0xb] sm:$0x1] %v141_v2 }
  0x1c   : > { %p322_p3 = por %p321_p2, %p320_p1 }
  0x1e   : > { %p323_p5 = pnand %p322_p3, %p316_p0 }
  0x20   : > { %326 = shalt.err (!%p323_p5)
}
  0x21   : > { %s327_s13 = scalar_lea.hbm %s469_s27, 256  ;;  %s331_s20 = scalar_lea.hbm %s523_s1, 768 }
  0x22   : > { %p328_p6 = scmp.ne.s32.totalorder %s469_s27, %s327_s13  ;;  %p332_p10 = scmp.lt.u32.totalorder %s469_s27, %s523_s1 }
  0x23   : > { %p333_p11 = scmp.lt.u32.totalorder %s331_s20, %s327_s13  ;;  %p335_p13 = scmp.lt.u32.totalorder %s327_s13, %s469_s27 }
  0x24   : > { %p329_p7 = pnand %p328_p6, %p447_p4 }
  0x25   : > { %p334_p12 = por %p333_p11, %p332_p10 }
  0x26   : > { %p330_p9 = pneg %p329_p7 }
  0x27   : > { %p336_p0 = por %p335_p13, %p334_p12 }
  0x29   : > { %p337_p1 = pnand %p336_p0, %p330_p9 }
  0x2b   : > { %340 = shalt.err (!%p337_p1)
}
  0x2c   : > { %s395_s23 = smov 128   ;;  %s396_s25 = smov 8  }
  0x2d   : > { %255 = dma.vmem_to_hbm [thread:$0]  (%p447_p4), %s471_s24, 256, %s469_s27, %s476_s3, %s395_s23, %s395_s23, %s396_s25  }
  0x2e PF: > { %p261_p2 = scmp.ge.s32.totalorder %s391_s11, 2  ;;  %s177_s26 = sand.u32 1, %s371_s6  }
  0x2f   : > { %s178_s28 = scalar_lea.sflag [#allocation3], %s177_s26 }
  0x30   : > { %p258_p3 = pnand %p261_p2, %p454_p8 }
  0x32   : > { %366 = dma.done.wait (!%p258_p3), %s178_s28, 256  }
  0x33   : > { %368 = vsyncadd (!%p258_p3), %s178_s28, 4294967040  ;;  %s14_s11 = sadd.s32 1, %s391_s11   ;;  %s526_s6 = smov %s375_s7 }
  0x34   : > { %p11_p5 = scmp.ge.s32.totalorder %s14_s11, 5   ;;  %s527_s7 = smov %s379_s8 }
  0x35   : > { %s528_s8 = smov %s460_s19  ;;  %s529_s9 = smov %s387_s10 }
  0x36   : > { %s530_s10 = smov %s532_s14  ;;  %13 = sbr.rel (!%p11_p5) target bundleno = 4 (0x4), region = 59 }
  0x3d   :  { %183 = vsyncpa [#allocation3], 1 }
  0x3e   :  { %185 = vsyncpa [#allocation3 + $0x1], 1 }

</bundles_post_ra>
